<compile_context>
chip_gen: v7x
topology: tpu7x:2x2x1
jax: 0.10.0
libtpu: 0.0.40
codegen_flags: <defaults>
</compile_context>

<pallas_src>
import functools

import jax
import jax.numpy as jnp
import numpy as np
from jax.experimental import pallas as pl
from jax.experimental.pallas import tpu as pltpu


def _round_up(x, m):
    return ((x + m - 1) // m) * m


# ---------------------------------------------------------------------------
# Kernel: one batch-tile x one chunk of Tc timesteps per grid iteration.
# ---------------------------------------------------------------------------
def _rnn_chunk_kernel(x_ref, h0_ref, w1x_ref, w1h_ref, b1_ref,
                      h_all_ref, h_carry, *, tc, bt):
    c = pl.program_id(1)                       # chunk index (serial axis)

    @pl.when(c == 0)
    def _init():                               # new batch tile -> reload h0
        h_carry[...] = h0_ref[...]

    # ---- Chunk prologue (off the serial chain): input projection for all Tc
    # steps in ONE MXU matmul, bias folded in.  bt % 8 == 0 so the leading-dim
    # collapse is a pure vreg relabeling.
    i = x_ref.shape[-1]
    x_flat = x_ref[...].reshape(tc * bt, i)                       # (Tc*Bt, I)
    xproj = (jnp.dot(x_flat, w1x_ref[...],
                     preferred_element_type=jnp.float32)
             + b1_ref[...])                                       # (Tc*Bt, Hp)

    # ---- Serial recurrence over the chunk (static unrolled; Tc is small,
    # only the H-wide h@W1h matmul sits on the dependency chain).
    h = h_carry[...]                                              # (Bt, Hp)
    w1h = w1h_ref[...]
    for s in range(tc):
        out1 = xproj[s * bt:(s + 1) * bt, :] + jnp.dot(
            h, w1h, preferred_element_type=jnp.float32)
        h = jnp.clip(out1, 0.0, 1.0)          # torch.clamp(out_1, 0, 1)
        h_all_ref[s] = h
    h_carry[...] = h


# ---------------------------------------------------------------------------
# One-time parameter preparation (transpose / split / zero-pad hidden to 128).
# ---------------------------------------------------------------------------
def prepare_params(w1, b1, w2, b2, input_size):
    """w1: (H, I+H) [PyTorch layout], b1: (H,), w2: (1, H), b2: (1,)."""
    hidden = w1.shape[0]
    assert w2.shape[0] == 1, "kernel specializes linear2 to output_size == 1"
    hp = _round_up(hidden, 128)                # lane-dense hidden dim
    w1x = jnp.zeros((input_size, hp), jnp.float32).at[:, :hidden].set(
        jnp.transpose(w1[:, :input_size]).astype(jnp.float32))
    w1h = jnp.zeros((hp, hp), jnp.float32).at[:hidden, :hidden].set(
        jnp.transpose(w1[:, input_size:]).astype(jnp.float32))
    b1p = jnp.zeros((1, hp), jnp.float32).at[:, :hidden].set(
        b1.reshape(1, hidden).astype(jnp.float32))
    return dict(w1x=w1x, w1h=w1h, b1=b1p,
                w2=w2.astype(jnp.float32), b2=b2.astype(jnp.float32),
                hidden=hidden, hp=hp, input_size=input_size)


# ---------------------------------------------------------------------------
# Full-sequence driver: one pallas_call for the whole recurrence.
# ---------------------------------------------------------------------------
def rnn_sequence(xs, h0, params, *, tc=16, bt_max=64):
    """xs: (T, B, I), h0: (B, H) -> (y (T,B,1), h (T,B,H))."""
    w1x, w1h, b1p = params["w1x"], params["w1h"], params["b1"]
    H, Hp, I = params["hidden"], params["hp"], params["input_size"]
    T, B, _ = xs.shape

    tc = max(1, min(tc, T))
    Tp = _round_up(T, tc)                      # pad T so every chunk is full
    Bp = _round_up(B, 8)                       # full f32 sublanes
    bt = min(Bp, bt_max)                       # batch tile (parallel axis)
    Bp = _round_up(Bp, bt)

    xs = xs.astype(jnp.float32)
    if (Tp, Bp) != (T, B):
        xs = jnp.pad(xs, ((0, Tp - T), (0, Bp - B), (0, 0)))
    h0p = jnp.zeros((Bp, Hp), jnp.float32).at[:B, :H].set(
        h0.astype(jnp.float32))                # padded lanes/rows stay 0

    nb, nc = Bp // bt, Tp // tc

    def resident(a):                           # constant index map -> DMA once
        return pl.BlockSpec(a.shape, lambda b, c: (0,) * a.ndim)

    kernel = functools.partial(_rnn_chunk_kernel, tc=tc, bt=bt)

    h_all = pl.pallas_call(
        kernel,
        out_shape=jax.ShapeDtypeStruct((Tp, Bp, Hp), jnp.float32),
        grid=(nb, nc),
        in_specs=[pl.BlockSpec((tc, bt, I), lambda b, c: (c, b, 0)),   # x chunk
                  pl.BlockSpec((bt, Hp), lambda b, c: (b, 0)),         # h0 tile
                  resident(w1x), resident(w1h), resident(b1p)],
        out_specs=pl.BlockSpec((tc, bt, Hp), lambda b, c: (c, b, 0)),  # h chunk
        scratch_shapes=[pltpu.VMEM((bt, Hp), jnp.float32)],            # h carry
        compiler_params=pltpu.CompilerParams(
            dimension_semantics=("parallel", "arbitrary")),
    )(xs, h0p, w1x, w1h, b1p)

    h_seq = h_all[:T, :B, :H]
    # Output head is not on the recurrence chain: one batched matvec + relu
    # outside the kernel (removes lane-1 slab + per-step masked stores).
    y_seq = jnp.maximum(
        jnp.einsum("tbh,oh->tbo", h_seq, params["w2"]) + params["b2"], 0.0)
    return y_seq, h_seq


def rnn_forward(x, last_hidden, params):
    """Single-step forward matching the PyTorch module signature."""
    y_seq, h_seq = rnn_sequence(x[None], last_hidden, params)
    return y_seq[0], h_seq[0]


# ---------------------------------------------------------------------------
# Pure-JAX references
# ---------------------------------------------------------------------------
def _reference_step(x, h, w1, b1, w2, b2):
    combined = jnp.concatenate([x, h], axis=1)
    out1 = combined @ w1.T + b1
    h1 = jnp.clip(out1, 0.0, 1.0)
    y = jnp.maximum(h1 @ w2.T + b2, 0.0)
    return y, h1


def _reference_sequence(xs, h0, w1, b1, w2, b2):
    def step(h, x):
        y, h1 = _reference_step(x, h, w1, b1, w2, b2)
        return h1, (y, h1)
    _, (ys, hs) = jax.lax.scan(step, h0, xs)
    return ys, hs


if __name__ == "__main__":
    hidden_size = 20
    input_size = 20
    output_size = 1
    batch = 2
    seq_len = 8

    key = jax.random.PRNGKey(0)
    kx, kh, kw1, kb1, kw2, kb2, kx2, kh2 = jax.random.split(key, 8)

    bound1 = 1.0 / np.sqrt(input_size + hidden_size)
    bound2 = 1.0 / np.sqrt(hidden_size)
    w1 = jax.random.uniform(kw1, (hidden_size, input_size + hidden_size),
                            jnp.float32, -bound1, bound1)
    b1 = jax.random.uniform(kb1, (hidden_size,), jnp.float32, -bound1, bound1)
    w2 = jax.random.uniform(kw2, (output_size, hidden_size),
                            jnp.float32, -bound2, bound2)
    b2 = jax.random.uniform(kb2, (output_size,), jnp.float32, -bound2, bound2)

    xs = jax.random.normal(kx, (seq_len, batch, input_size), jnp.float32)
    h0 = jax.random.uniform(kh, (batch, hidden_size), jnp.float32)

    params = prepare_params(w1, b1, w2, b2, input_size)   # one-time prep

    # --- Fused full-sequence kernel (toy shapes) ---------------------------
    y_seq, h_seq = rnn_sequence(xs, h0, params)
    jax.block_until_ready((y_seq, h_seq))
    y_ref, h_ref = _reference_sequence(xs, h0, w1, b1, w2, b2)
    assert y_seq.shape == (seq_len, batch, output_size)
    assert h_seq.shape == (seq_len, batch, hidden_size)
    np.testing.assert_allclose(np.asarray(y_seq), np.asarray(y_ref),
                               rtol=1e-5, atol=1e-5)
    np.testing.assert_allclose(np.asarray(h_seq), np.asarray(h_ref),
                               rtol=1e-5, atol=1e-5)

    # --- Padding-stress check: T not a multiple of Tc, B not a multiple of 8
    T2, B2 = 37, 11
    xs2 = jax.random.normal(kx2, (T2, B2, input_size), jnp.float32)
    h02 = jax.random.uniform(kh2, (B2, hidden_size), jnp.float32)
    y2, h2 = rnn_sequence(xs2, h02, params, tc=16)
    jax.block_until_ready((y2, h2))
    y2_ref, h2_ref = _reference_sequence(xs2, h02, w1, b1, w2, b2)
    np.testing.assert_allclose(np.asarray(y2), np.asarray(y2_ref),
                               rtol=1e-5, atol=1e-5)
    np.testing.assert_allclose(np.asarray(h2), np.asarray(h2_ref),
                               rtol=1e-5, atol=1e-5)

    # --- Single-step call (same signature as the PyTorch forward) ----------
    y1, h1 = rnn_forward(xs[0], h0, params)
    jax.block_until_ready((y1, h1))
    y1_ref, h1_ref = _reference_step(xs[0], h0, w1, b1, w2, b2)
    np.testing.assert_allclose(np.asarray(y1), np.asarray(y1_ref),
                               rtol=1e-5, atol=1e-5)
    np.testing.assert_allclose(np.asarray(h1), np.asarray(h1_ref),
                               rtol=1e-5, atol=1e-5)

    print("KERNEL_OK")
</pallas_src>

<mosaic_0001>
module attributes {stable_mosaic.version = 11 : i64} {
  func.func @_rnn_chunk_kernel(%arg0: i32, %arg1: i32, %arg2: memref<8x8x20xf32, #tpu.memory_space<vmem>>, %arg3: memref<8x128xf32, #tpu.memory_space<vmem>>, %arg4: memref<20x128xf32, #tpu.memory_space<vmem>>, %arg5: memref<128x128xf32, #tpu.memory_space<vmem>>, %arg6: memref<1x128xf32, #tpu.memory_space<vmem>>, %arg7: memref<8x8x128xf32, #tpu.memory_space<vmem>>, %arg8: memref<8x128xf32, #tpu.memory_space<vmem>>) attributes {dimension_semantics = [#tpu.dimension_semantics<parallel>, #tpu.dimension_semantics<arbitrary>], iteration_bounds = array<i64: 1, 1>, scalar_prefetch = 0 : i64, scratch_operands = 1 : i64, tpu.core_type = #tpu.core_type<tc>, window_params = [{transform_indices = @transform_0, window_bounds = array<i64: 8, 8, 20>}, {transform_indices = @transform_1, window_bounds = array<i64: 8, 128>}, {pipeline_mode = #tpu.pipeline_mode<synchronous>, transform_indices = @transform_2, window_bounds = array<i64: 20, 128>}, {pipeline_mode = #tpu.pipeline_mode<synchronous>, transform_indices = @transform_3, window_bounds = array<i64: 128, 128>}, {pipeline_mode = #tpu.pipeline_mode<synchronous>, transform_indices = @transform_4, window_bounds = array<i64: 1, 128>}, {transform_indices = @transform_5, window_bounds = array<i64: 8, 8, 128>}]} {
    %c0_i32 = arith.constant 0 : i32
    %0 = arith.cmpi eq, %arg1, %c0_i32 : i32
    %1 = arith.extui %0 : i1 to i32
    %c0_i32_0 = arith.constant 0 : i32
    %2 = arith.cmpi ne, %1, %c0_i32_0 : i32
    scf.if %2 {
      %c0_54 = arith.constant 0 : index
      %c0_55 = arith.constant 0 : index
      %93 = vector.load %arg3[%c0_54, %c0_55] : memref<8x128xf32, #tpu.memory_space<vmem>>, vector<8x128xf32>
      %c0_56 = arith.constant 0 : index
      %c0_57 = arith.constant 0 : index
      %94 = vector.load %arg8[%c0_56, %c0_57] : memref<8x128xf32, #tpu.memory_space<vmem>>, vector<8x128xf32>
      tpu.vector_store %arg8[%c0_56, %c0_57], %93 {strides = array<i32>} : memref<8x128xf32, #tpu.memory_space<vmem>>, vector<8x128xf32>,
    } else {
    }
    %c0 = arith.constant 0 : index
    %c0_1 = arith.constant 0 : index
    %c0_2 = arith.constant 0 : index
    %3 = vector.load %arg2[%c0, %c0_1, %c0_2] : memref<8x8x20xf32, #tpu.memory_space<vmem>>, vector<8x8x20xf32>
    %4 = vector.shape_cast %3 : vector<8x8x20xf32> to vector<64x20xf32>
    %c0_3 = arith.constant 0 : index
    %c0_4 = arith.constant 0 : index
    %5 = vector.load %arg4[%c0_3, %c0_4] : memref<20x128xf32, #tpu.memory_space<vmem>>, vector<20x128xf32>
    %cst = arith.constant dense<0.000000e+00> : vector<64x128xf32>
    %6 = tpu.matmul %4, %5, %cst {dimension_numbers = #tpu.dot_dimension_numbers<[1], [0], [0], [1], [0, 0, 1, 1], [], []>} : vector<64x20xf32>, vector<20x128xf32>, vector<64x128xf32> -> vector<64x128xf32>
    %c0_5 = arith.constant 0 : index
    %c0_6 = arith.constant 0 : index
    %7 = vector.load %arg6[%c0_5, %c0_6] : memref<1x128xf32, #tpu.memory_space<vmem>>, vector<1x128xf32>
    %8 = vector.broadcast %7 : vector<1x128xf32> to vector<64x128xf32>
    %9 = arith.addf %6, %8 : vector<64x128xf32>
    %c0_7 = arith.constant 0 : index
    %c0_8 = arith.constant 0 : index
    %10 = vector.load %arg8[%c0_7, %c0_8] : memref<8x128xf32, #tpu.memory_space<vmem>>, vector<8x128xf32>
    %c0_9 = arith.constant 0 : index
    %c0_10 = arith.constant 0 : index
    %11 = vector.load %arg5[%c0_9, %c0_10] : memref<128x128xf32, #tpu.memory_space<vmem>>, vector<128x128xf32>
    %12 = vector.extract_strided_slice %9 {offsets = [0, 0], sizes = [8, 128], strides = [1, 1]} : vector<64x128xf32> to vector<8x128xf32>
    %cst_11 = arith.constant dense<0.000000e+00> : vector<8x128xf32>
    %13 = tpu.matmul %10, %11, %cst_11 {dimension_numbers = #tpu.dot_dimension_numbers<[1], [0], [0], [1], [0, 0, 1, 1], [], []>} : vector<8x128xf32>, vector<128x128xf32>, vector<8x128xf32> -> vector<8x128xf32>
    %14 = arith.addf %12, %13 : vector<8x128xf32>
    %cst_12 = arith.constant 0.000000e+00 : f32
    %cst_13 = arith.constant 1.000000e+00 : f32
    %15 = vector.broadcast %cst_12 : f32 to vector<8x128xf32>
    %16 = arith.maximumf %15, %14 : vector<8x128xf32>
    %17 = vector.broadcast %cst_13 : f32 to vector<8x128xf32>
    %18 = arith.minimumf %17, %16 : vector<8x128xf32>
    %c0_14 = arith.constant 0 : index
    %c0_15 = arith.constant 0 : index
    %c0_16 = arith.constant 0 : index
    %19 = vector.load %arg7[%c0_14, %c0_15, %c0_16] : memref<8x8x128xf32, #tpu.memory_space<vmem>>, vector<1x8x128xf32>
    %20 = vector.shape_cast %19 : vector<1x8x128xf32> to vector<8x128xf32>
    %21 = vector.shape_cast %18 : vector<8x128xf32> to vector<1x8x128xf32>
    tpu.vector_store %arg7[%c0_14, %c0_15, %c0_16], %21 {strides = array<i32>} : memref<8x8x128xf32, #tpu.memory_space<vmem>>, vector<1x8x128xf32>,
    %22 = vector.extract_strided_slice %9 {offsets = [8, 0], sizes = [8, 128], strides = [1, 1]} : vector<64x128xf32> to vector<8x128xf32>
    %cst_17 = arith.constant dense<0.000000e+00> : vector<8x128xf32>
    %23 = tpu.matmul %18, %11, %cst_17 {dimension_numbers = #tpu.dot_dimension_numbers<[1], [0], [0], [1], [0, 0, 1, 1], [], []>} : vector<8x128xf32>, vector<128x128xf32>, vector<8x128xf32> -> vector<8x128xf32>
    %24 = arith.addf %22, %23 : vector<8x128xf32>
    %cst_18 = arith.constant 0.000000e+00 : f32
    %cst_19 = arith.constant 1.000000e+00 : f32
    %25 = vector.broadcast %cst_18 : f32 to vector<8x128xf32>
    %26 = arith.maximumf %25, %24 : vector<8x128xf32>
    %27 = vector.broadcast %cst_19 : f32 to vector<8x128xf32>
    %28 = arith.minimumf %27, %26 : vector<8x128xf32>
    %c1 = arith.constant 1 : index
    %c0_20 = arith.constant 0 : index
    %c0_21 = arith.constant 0 : index
    %29 = vector.load %arg7[%c1, %c0_20, %c0_21] : memref<8x8x128xf32, #tpu.memory_space<vmem>>, vector<1x8x128xf32>
    %30 = vector.shape_cast %29 : vector<1x8x128xf32> to vector<8x128xf32>
    %31 = vector.shape_cast %28 : vector<8x128xf32> to vector<1x8x128xf32>
    tpu.vector_store %arg7[%c1, %c0_20, %c0_21], %31 {strides = array<i32>} : memref<8x8x128xf32, #tpu.memory_space<vmem>>, vector<1x8x128xf32>,
    %32 = vector.extract_strided_slice %9 {offsets = [16, 0], sizes = [8, 128], strides = [1, 1]} : vector<64x128xf32> to vector<8x128xf32>
    %cst_22 = arith.constant dense<0.000000e+00> : vector<8x128xf32>
    %33 = tpu.matmul %28, %11, %cst_22 {dimension_numbers = #tpu.dot_dimension_numbers<[1], [0], [0], [1], [0, 0, 1, 1], [], []>} : vector<8x128xf32>, vector<128x128xf32>, vector<8x128xf32> -> vector<8x128xf32>
    %34 = arith.addf %32, %33 : vector<8x128xf32>
    %cst_23 = arith.constant 0.000000e+00 : f32
    %cst_24 = arith.constant 1.000000e+00 : f32
    %35 = vector.broadcast %cst_23 : f32 to vector<8x128xf32>
    %36 = arith.maximumf %35, %34 : vector<8x128xf32>
    %37 = vector.broadcast %cst_24 : f32 to vector<8x128xf32>
    %38 = arith.minimumf %37, %36 : vector<8x128xf32>
    %c2 = arith.constant 2 : index
    %c0_25 = arith.constant 0 : index
    %c0_26 = arith.constant 0 : index
    %39 = vector.load %arg7[%c2, %c0_25, %c0_26] : memref<8x8x128xf32, #tpu.memory_space<vmem>>, vector<1x8x128xf32>
    %40 = vector.shape_cast %39 : vector<1x8x128xf32> to vector<8x128xf32>
    %41 = vector.shape_cast %38 : vector<8x128xf32> to vector<1x8x128xf32>
    tpu.vector_store %arg7[%c2, %c0_25, %c0_26], %41 {strides = array<i32>} : memref<8x8x128xf32, #tpu.memory_space<vmem>>, vector<1x8x128xf32>,
    %42 = vector.extract_strided_slice %9 {offsets = [24, 0], sizes = [8, 128], strides = [1, 1]} : vector<64x128xf32> to vector<8x128xf32>
    %cst_27 = arith.constant dense<0.000000e+00> : vector<8x128xf32>
    %43 = tpu.matmul %38, %11, %cst_27 {dimension_numbers = #tpu.dot_dimension_numbers<[1], [0], [0], [1], [0, 0, 1, 1], [], []>} : vector<8x128xf32>, vector<128x128xf32>, vector<8x128xf32> -> vector<8x128xf32>
    %44 = arith.addf %42, %43 : vector<8x128xf32>
    %cst_28 = arith.constant 0.000000e+00 : f32
    %cst_29 = arith.constant 1.000000e+00 : f32
    %45 = vector.broadcast %cst_28 : f32 to vector<8x128xf32>
    %46 = arith.maximumf %45, %44 : vector<8x128xf32>
    %47 = vector.broadcast %cst_29 : f32 to vector<8x128xf32>
    %48 = arith.minimumf %47, %46 : vector<8x128xf32>
    %c3 = arith.constant 3 : index
    %c0_30 = arith.constant 0 : index
    %c0_31 = arith.constant 0 : index
    %49 = vector.load %arg7[%c3, %c0_30, %c0_31] : memref<8x8x128xf32, #tpu.memory_space<vmem>>, vector<1x8x128xf32>
    %50 = vector.shape_cast %49 : vector<1x8x128xf32> to vector<8x128xf32>
    %51 = vector.shape_cast %48 : vector<8x128xf32> to vector<1x8x128xf32>
    tpu.vector_store %arg7[%c3, %c0_30, %c0_31], %51 {strides = array<i32>} : memref<8x8x128xf32, #tpu.memory_space<vmem>>, vector<1x8x128xf32>,
    %52 = vector.extract_strided_slice %9 {offsets = [32, 0], sizes = [8, 128], strides = [1, 1]} : vector<64x128xf32> to vector<8x128xf32>
    %cst_32 = arith.constant dense<0.000000e+00> : vector<8x128xf32>
    %53 = tpu.matmul %48, %11, %cst_32 {dimension_numbers = #tpu.dot_dimension_numbers<[1], [0], [0], [1], [0, 0, 1, 1], [], []>} : vector<8x128xf32>, vector<128x128xf32>, vector<8x128xf32> -> vector<8x128xf32>
    %54 = arith.addf %52, %53 : vector<8x128xf32>
    %cst_33 = arith.constant 0.000000e+00 : f32
    %cst_34 = arith.constant 1.000000e+00 : f32
    %55 = vector.broadcast %cst_33 : f32 to vector<8x128xf32>
    %56 = arith.maximumf %55, %54 : vector<8x128xf32>
    %57 = vector.broadcast %cst_34 : f32 to vector<8x128xf32>
    %58 = arith.minimumf %57, %56 : vector<8x128xf32>
    %c4 = arith.constant 4 : index
    %c0_35 = arith.constant 0 : index
    %c0_36 = arith.constant 0 : index
    %59 = vector.load %arg7[%c4, %c0_35, %c0_36] : memref<8x8x128xf32, #tpu.memory_space<vmem>>, vector<1x8x128xf32>
    %60 = vector.shape_cast %59 : vector<1x8x128xf32> to vector<8x128xf32>
    %61 = vector.shape_cast %58 : vector<8x128xf32> to vector<1x8x128xf32>
    tpu.vector_store %arg7[%c4, %c0_35, %c0_36], %61 {strides = array<i32>} : memref<8x8x128xf32, #tpu.memory_space<vmem>>, vector<1x8x128xf32>,
    %62 = vector.extract_strided_slice %9 {offsets = [40, 0], sizes = [8, 128], strides = [1, 1]} : vector<64x128xf32> to vector<8x128xf32>
    %cst_37 = arith.constant dense<0.000000e+00> : vector<8x128xf32>
    %63 = tpu.matmul %58, %11, %cst_37 {dimension_numbers = #tpu.dot_dimension_numbers<[1], [0], [0], [1], [0, 0, 1, 1], [], []>} : vector<8x128xf32>, vector<128x128xf32>, vector<8x128xf32> -> vector<8x128xf32>
    %64 = arith.addf %62, %63 : vector<8x128xf32>
    %cst_38 = arith.constant 0.000000e+00 : f32
    %cst_39 = arith.constant 1.000000e+00 : f32
    %65 = vector.broadcast %cst_38 : f32 to vector<8x128xf32>
    %66 = arith.maximumf %65, %64 : vector<8x128xf32>
    %67 = vector.broadcast %cst_39 : f32 to vector<8x128xf32>
    %68 = arith.minimumf %67, %66 : vector<8x128xf32>
    %c5 = arith.constant 5 : index
    %c0_40 = arith.constant 0 : index
    %c0_41 = arith.constant 0 : index
    %69 = vector.load %arg7[%c5, %c0_40, %c0_41] : memref<8x8x128xf32, #tpu.memory_space<vmem>>, vector<1x8x128xf32>
    %70 = vector.shape_cast %69 : vector<1x8x128xf32> to vector<8x128xf32>
    %71 = vector.shape_cast %68 : vector<8x128xf32> to vector<1x8x128xf32>
    tpu.vector_store %arg7[%c5, %c0_40, %c0_41], %71 {strides = array<i32>} : memref<8x8x128xf32, #tpu.memory_space<vmem>>, vector<1x8x128xf32>,
    %72 = vector.extract_strided_slice %9 {offsets = [48, 0], sizes = [8, 128], strides = [1, 1]} : vector<64x128xf32> to vector<8x128xf32>
    %cst_42 = arith.constant dense<0.000000e+00> : vector<8x128xf32>
    %73 = tpu.matmul %68, %11, %cst_42 {dimension_numbers = #tpu.dot_dimension_numbers<[1], [0], [0], [1], [0, 0, 1, 1], [], []>} : vector<8x128xf32>, vector<128x128xf32>, vector<8x128xf32> -> vector<8x128xf32>
    %74 = arith.addf %72, %73 : vector<8x128xf32>
    %cst_43 = arith.constant 0.000000e+00 : f32
    %cst_44 = arith.constant 1.000000e+00 : f32
    %75 = vector.broadcast %cst_43 : f32 to vector<8x128xf32>
    %76 = arith.maximumf %75, %74 : vector<8x128xf32>
    %77 = vector.broadcast %cst_44 : f32 to vector<8x128xf32>
    %78 = arith.minimumf %77, %76 : vector<8x128xf32>
    %c6 = arith.constant 6 : index
    %c0_45 = arith.constant 0 : index
    %c0_46 = arith.constant 0 : index
    %79 = vector.load %arg7[%c6, %c0_45, %c0_46] : memref<8x8x128xf32, #tpu.memory_space<vmem>>, vector<1x8x128xf32>
    %80 = vector.shape_cast %79 : vector<1x8x128xf32> to vector<8x128xf32>
    %81 = vector.shape_cast %78 : vector<8x128xf32> to vector<1x8x128xf32>
    tpu.vector_store %arg7[%c6, %c0_45, %c0_46], %81 {strides = array<i32>} : memref<8x8x128xf32, #tpu.memory_space<vmem>>, vector<1x8x128xf32>,
    %82 = vector.extract_strided_slice %9 {offsets = [56, 0], sizes = [8, 128], strides = [1, 1]} : vector<64x128xf32> to vector<8x128xf32>
    %cst_47 = arith.constant dense<0.000000e+00> : vector<8x128xf32>
    %83 = tpu.matmul %78, %11, %cst_47 {dimension_numbers = #tpu.dot_dimension_numbers<[1], [0], [0], [1], [0, 0, 1, 1], [], []>} : vector<8x128xf32>, vector<128x128xf32>, vector<8x128xf32> -> vector<8x128xf32>
    %84 = arith.addf %82, %83 : vector<8x128xf32>
    %cst_48 = arith.constant 0.000000e+00 : f32
    %cst_49 = arith.constant 1.000000e+00 : f32
    %85 = vector.broadcast %cst_48 : f32 to vector<8x128xf32>
    %86 = arith.maximumf %85, %84 : vector<8x128xf32>
    %87 = vector.broadcast %cst_49 : f32 to vector<8x128xf32>
    %88 = arith.minimumf %87, %86 : vector<8x128xf32>
    %c7 = arith.constant 7 : index
    %c0_50 = arith.constant 0 : index
    %c0_51 = arith.constant 0 : index
    %89 = vector.load %arg7[%c7, %c0_50, %c0_51] : memref<8x8x128xf32, #tpu.memory_space<vmem>>, vector<1x8x128xf32>
    %90 = vector.shape_cast %89 : vector<1x8x128xf32> to vector<8x128xf32>
    %91 = vector.shape_cast %88 : vector<8x128xf32> to vector<1x8x128xf32>
    tpu.vector_store %arg7[%c7, %c0_50, %c0_51], %91 {strides = array<i32>} : memref<8x8x128xf32, #tpu.memory_space<vmem>>, vector<1x8x128xf32>,
    %c0_52 = arith.constant 0 : index
    %c0_53 = arith.constant 0 : index
    %92 = vector.load %arg8[%c0_52, %c0_53] : memref<8x128xf32, #tpu.memory_space<vmem>>, vector<8x128xf32>
    tpu.vector_store %arg8[%c0_52, %c0_53], %88 {strides = array<i32>} : memref<8x128xf32, #tpu.memory_space<vmem>>, vector<8x128xf32>,
    return
  }
  func.func @transform_0(%arg0: i32, %arg1: i32) -> (i32, i32, i32) {
    %c0_i32 = arith.constant 0 : i32
    %c0_i32_0 = arith.constant 0 : i32
    return %arg1, %arg0, %c0_i32 : i32, i32, i32
  }
  func.func @transform_1(%arg0: i32, %arg1: i32) -> (i32, i32) {
    %c0_i32 = arith.constant 0 : i32
    %c0_i32_0 = arith.constant 0 : i32
    return %arg0, %c0_i32 : i32, i32
  }
  func.func @transform_2(%arg0: i32, %arg1: i32) -> (i32, i32) {
    %c0_i32 = arith.constant 0 : i32
    %c0_i32_0 = arith.constant 0 : i32
    %c0_i32_1 = arith.constant 0 : i32
    return %c0_i32, %c0_i32_0 : i32, i32
  }
  func.func @transform_3(%arg0: i32, %arg1: i32) -> (i32, i32) {
    %c0_i32 = arith.constant 0 : i32
    %c0_i32_0 = arith.constant 0 : i32
    %c0_i32_1 = arith.constant 0 : i32
    return %c0_i32, %c0_i32_0 : i32, i32
  }
  func.func @transform_4(%arg0: i32, %arg1: i32) -> (i32, i32) {
    %c0_i32 = arith.constant 0 : i32
    %c0_i32_0 = arith.constant 0 : i32
    %c0_i32_1 = arith.constant 0 : i32
    return %c0_i32, %c0_i32_0 : i32, i32
  }
  func.func @transform_5(%arg0: i32, %arg1: i32) -> (i32, i32, i32) {
    %c0_i32 = arith.constant 0 : i32
    %c0_i32_0 = arith.constant 0 : i32
    return %arg1, %arg0, %c0_i32 : i32, i32, i32
  }
}

</mosaic_0001>

<bundles_post_ra>
// kernel: tpu_custom_call.1
= control target key start
LH: loop header
LB: loop body
LE: loop exit
PB: predicated region body
PF: predicated region fallthrough
CT: control target
= control target key end

     0   :  { %10 = vsyncpa [#allocation4], 0  ;;  %s1971_s0 = inlined_call_operand.hbm [shape: f32[8,8,20], index: 0, kind: input, shape index: {}]   ;;  %s1972_s1 = inlined_call_operand.hbm [shape: f32[8,128], index: 1, kind: input, shape index: {}]   ;;  %s1973_s2 = inlined_call_operand.hbm [shape: f32[20,128], index: 2, kind: input, shape index: {}]   ;;  %s1974_s3 = inlined_call_operand.hbm [shape: f32[128,128], index: 3, kind: input, shape index: {}]   ;;  %s1975_s4 = inlined_call_operand.vmem [shape: f32[1,128], index: 4, kind: input, shape index: {}]   ;;  %s1976_s5 = inlined_call_operand.hbm [shape: f32[8,8,128], index: 5, kind: output, shape index: {}]  }
   0x1   :  { %11 = vsyncpa [#allocation7], 0 }
   0x2   :  { %12 = vsyncpa [#allocation10], 0 }
   0x3   :  { %13 = vsyncpa [#allocation5], 0  ;;  %s1647_s18 = smov [#allocation6]   ;;  %s1648_s20 = smov [#allocation3]  }
   0x4   :  { %s32_s19 = sshll.u32 %s1647_s18, 4  ;;  %s19_s21 = sshll.u32 %s1648_s20, 4  ;;  %s33_s19 = int_to_ptr.vmem [resolvable:$true] %s32_s19  ;;  %s1687_s21 = int_to_ptr.vmem [resolvable:$true] %s19_s21 }
   0x5   :  { %s1529_s24 = scalar_lea.hbm %s1972_s1, 128 }
   0x6   :  { %p1530_p0 = scmp.ne.s32.totalorder %s1972_s1, %s1529_s24  ;;  %p1533_p1 = scmp.lt.u32.totalorder %s1529_s24, %s1972_s1 }
   0x8   :  { %p1535_p2 = pnand %p1533_p1, %p1530_p0 }
   0xa   :  { %1538 = shalt.err (!%p1535_p2)
}
   0xb   :  { %s1539_s29 = scalar_lea.vmem %s33_s19, 128  ;;  %p1544_p4 = scmp.lt.s32.totalorder %s33_s19, %s33_s19 }
   0xc   :  { %p1540_p3 = scmp.ne.s32.totalorder %s33_s19, %s1539_s29  ;;  %p1545_p5 = scmp.lt.s32.totalorder %s1539_s29, %s1539_s29 }
   0xe   :  { %p1546_p6 = por %p1545_p5, %p1544_p4 }
  0x10   :  { %p1547_p7 = pnand %p1546_p6, %p1540_p3 }
  0x12   :  { %1550 = shalt.err (!%p1547_p7)
}
  0x13   :  { %35 = dma.hbm_to_vmem [thread:$0]  %s1972_s1, 128, %s33_s19, [#allocation7]  }
  0x14   :  { %s1551_s9 = scalar_lea.hbm %s1971_s0, 1024 }
  0x15   :  { %p1552_p8 = scmp.ne.s32.totalorder %s1971_s0, %s1551_s9  ;;  %p1555_p9 = scmp.lt.u32.totalorder %s1551_s9, %s1971_s0 }
  0x17   :  { %p1557_p10 = pnand %p1555_p9, %p1552_p8 }
  0x19   :  { %1560 = shalt.err (!%p1557_p10)
}
  0x1a   :  { %s1561_s14 = scalar_lea.vmem %s1687_s21, 1024  ;;  %p1566_p12 = scmp.lt.s32.totalorder %s1687_s21, %s1687_s21 }
  0x1b   :  { %p1562_p11 = scmp.ne.s32.totalorder %s1687_s21, %s1561_s14  ;;  %p1567_p13 = scmp.lt.s32.totalorder %s1561_s14, %s1561_s14 }
  0x1d   :  { %p1568_p0 = por %p1567_p13, %p1566_p12 }
  0x1f   :  { %p1569_p1 = pnand %p1568_p0, %p1562_p11 }
  0x21   :  { %1572 = shalt.err (!%p1569_p1)
}
  0x22   :  { %s1649_s1 = smov 128   ;;  %s1650_s15 = smov 8  }
  0x23   :  { %25 = dma.hbm_to_vmem [thread:$0]  %s1971_s0, 1024, %s1687_s21, [#allocation4], %s1649_s1, %s1649_s1, %s1650_s15  }
  0x24   :  { %s1651_s18 = smov [#allocation8]   ;;  %s1652_s20 = smov [#allocation9]  }
  0x25   :  { %s41_s19 = sshll.u32 %s1651_s18, 4  ;;  %s53_s22 = sshll.u32 %s1652_s20, 4  ;;  %s42_s19 = int_to_ptr.vmem [resolvable:$true] %s41_s19  ;;  %s1721_s22 = int_to_ptr.vmem [resolvable:$true] %s53_s22 }
  0x26   :  { %s1573_s25 = scalar_lea.hbm %s1973_s2, 384 }
  0x27   :  { %p1574_p2 = scmp.ne.s32.totalorder %s1973_s2, %s1573_s25  ;;  %p1577_p3 = scmp.lt.u32.totalorder %s1573_s25, %s1973_s2 }
  0x29   :  { %p1579_p4 = pnand %p1577_p3, %p1574_p2 }
  0x2b   :  { %1582 = shalt.err (!%p1579_p4)
}
  0x2c   :  { %s1583_s0 = scalar_lea.vmem %s42_s19, 384  ;;  %p1588_p6 = scmp.lt.s32.totalorder %s42_s19, %s42_s19 }
  0x2d   :  { %p1584_p5 = scmp.ne.s32.totalorder %s42_s19, %s1583_s0  ;;  %p1589_p7 = scmp.lt.s32.totalorder %s1583_s0, %s1583_s0 }
  0x2f   :  { %p1590_p8 = por %p1589_p7, %p1588_p6 }
  0x31   :  { %p1591_p9 = pnand %p1590_p8, %p1584_p5 }
  0x33   :  { %1594 = shalt.err (!%p1591_p9)
}
  0x34   :  { %47 = dma.hbm_to_vmem [thread:$0]  %s1973_s2, 384, %s42_s19, [#allocation7], %s1649_s1, %s1649_s1, %s1650_s15  }
  0x35   :  { %s1595_s8 = scalar_lea.hbm %s1974_s3, 2048 }
  0x36   :  { %p1596_p10 = scmp.ne.s32.totalorder %s1974_s3, %s1595_s8  ;;  %p1599_p11 = scmp.lt.u32.totalorder %s1595_s8, %s1974_s3 }
  0x38   :  { %p1601_p12 = pnand %p1599_p11, %p1596_p10 }
  0x3a   :  { %1604 = shalt.err (!%p1601_p12)
}
  0x3b   :  { %s1605_s13 = scalar_lea.vmem %s1721_s22, 2048  ;;  %p1610_p0 = scmp.lt.s32.totalorder %s1721_s22, %s1721_s22 }
  0x3c   :  { %p1606_p13 = scmp.ne.s32.totalorder %s1721_s22, %s1605_s13  ;;  %p1611_p1 = scmp.lt.s32.totalorder %s1605_s13, %s1605_s13 }
  0x3e   :  { %p1612_p2 = por %p1611_p1, %p1610_p0 }
  0x40   :  { %p1613_p3 = pnand %p1612_p2, %p1606_p13 }
  0x42   :  { %1616 = shalt.err (!%p1613_p3)
}
  0x43   :  { %59 = dma.hbm_to_vmem [thread:$0]  %s1974_s3, 2048, %s1721_s22, [#allocation10], %s1649_s1, %s1649_s1, %s1650_s15  }
  0x44   :  { %1639 = dma.done.wait [#allocation4], 1024  }
  0x45   :  { %1640 = vsyncadd [#allocation4], 4294966272 }
  0x46   :  { %1641 = dma.done.wait [#allocation7], 512  }
  0x47   :  { %1642 = vsyncadd [#allocation7], 4294966784 }
  0x48   :  { %1643 = dma.done.wait [#allocation10], 2048  }
  0x49   :  { %1644 = vsyncadd [#allocation10], 4294965248  ;;  %v1653_v0 = vmov 0.0|0.0   ;;  %vm1654_vm0 = vmmov 0   ;;  %v1655_v1 = vmov 0.0   ;;  %v233_v2 = vld [vmem:[#allocation9] sm:$0xff] }
  0x4a   :  { %1327 = vmatprep.subr.bf16.mxu1 %v1653_v0  ;;  %1075 = vmatprep.mubr.msk.f32.mxu1 %vm1654_vm0, %v1655_v1  ;;  %v234_v3 = vld [vmem:[#allocation9 + $0x8] sm:$0xff]  ;;  %v235_v4 = vld [vmem:[#allocation9 + $0x10] sm:$0xff]  ;;  %v236_v6 = vld [vmem:[#allocation9 + $0x18] sm:$0xff]  ;;  %vm98_vm1 = vcmask 162816   ;;  %vm123_vm2 = vcmask 1043456  }
  0x4b   :  { %v1761_v5 = vpack.c.bf16 %v234_v3, %v233_v2  ;;  %v1764_v7 = vpack.c.bf16 %v236_v6, %v235_v4  ;;  %v237_v8 = vld [vmem:[#allocation9 + $0x20] sm:$0xff]  ;;  %v238_v9 = vld [vmem:[#allocation9 + $0x28] sm:$0xff]  ;;  %v89_v11 = vld [vmem:[#allocation8 + $0x8] sm:$0xff] }
  0x4c   :  { %v88_v10 = vld [vmem:[#allocation8] sm:$0xff]  ;;  %v80_v13 = vld [vmem:[#allocation3] sm:$0xff]  ;;  %v90_v14 = vld [vmem:[#allocation8 + $0x10] sm:$0xf]  ;;  %v1769_v15 = vpack.c.bf16 %v238_v9, %v237_v8 }
  0x4d   :  { %1329 = vmatpush3.bf16.msra.mxu1 %v1761_v5  ;;  %v1323_v12 = vpack.c.bf16 %v89_v11, %v88_v10  ;;  %1031 = vmatprep.mubr.msk.f32.mxu0 %vm98_vm1, %v80_v13  ;;  %v239_v16 = vld [vmem:[#allocation9 + $0x30] sm:$0xff]  ;;  %v240_v17 = vld [vmem:[#allocation9 + $0x38] sm:$0xff]  ;;  %v81_v18 = vld [vmem:[#allocation3 + $0x8] sm:$0xff] }
  0x4e   :  { %1330 = vmatprep.subr.bf16.mxu1 %v1653_v0  ;;  %v1774_v19 = vpack.c.bf16 %v240_v17, %v239_v16  ;;  %v82_v20 = vld [vmem:[#allocation3 + $0x10] sm:$0xff]  ;;  %v241_v21 = vld [vmem:[#allocation9 + $0x40] sm:$0xff]  ;;  %v242_v22 = vld [vmem:[#allocation9 + $0x48] sm:$0xff] }
  0x4f   :  { %1324 = vmatprep.subr.bf16.mxu0 %v1323_v12  ;;  %v83_v23 = vld [vmem:[#allocation3 + $0x18] sm:$0xff]  ;;  %v1783_v24 = vpack.c.bf16 %v242_v22, %v241_v21  ;;  %v243_v25 = vld [vmem:[#allocation9 + $0x50] sm:$0xff]  ;;  %v245_v28 = vld [vmem:[#allocation9 + $0x60] sm:$0xff] }
  0x50   :  { %1326 = vmatpush3.bf16.msra.mxu0 %v1323_v12  ;;  %v244_v26 = vld [vmem:[#allocation9 + $0x58] sm:$0xff]  ;;  %v246_v29 = vld [vmem:[#allocation9 + $0x68] sm:$0xff]  ;;  %v247_v31 = vld [vmem:[#allocation9 + $0x70] sm:$0xff] }
  0x51   :  { %1332 = vmatpush3.bf16.msra.mxu1 %v1764_v7  ;;  %1029 = vmatprep.subr.msk.mxu0 %vm123_vm2, %v90_v14  ;;  %v1790_v27 = vpack.c.bf16 %v244_v26, %v243_v25  ;;  %v1796_v30 = vpack.c.bf16 %v246_v29, %v245_v28  ;;  %v248_v32 = vld [vmem:[#allocation9 + $0x78] sm:$0xff]  ;;  %v78_v34 = vld [vmem:[#allocation6] sm:$0xff]  ;;  %v85_v36 = vld [vmem:[#allocation3 + $0x28] sm:$0xff] }
  0x52   :  { %1333 = vmatprep.subr.bf16.mxu1 %v1653_v0  ;;  %v1802_v33 = vpack.c.bf16 %v248_v32, %v247_v31  ;;  %v84_v35 = vld [vmem:[#allocation3 + $0x20] sm:$0xff]  ;;  %v86_v37 = vld [vmem:[#allocation3 + $0x30] sm:$0xff]  ;;  %v87_v38 = vld [vmem:[#allocation3 + $0x38] sm:$0xff] }
  0x53   :  { %v1845_v43 = vld [vmem:[%s1975_s4] ss:$0 sm:$0xff]  ;;  %s1656_s4 = smov [#allocation11]  }
  0x54   :  { %1030 = vmatpush3.msk.msra.mxu0 %vm123_vm2, %v90_v14  ;;  %s854_s17 = sshll.u32 %s1656_s4, 4  ;;  %s855_s17 = int_to_ptr.vmem [resolvable:$true] %s854_s17 }
  0x55   :  { %1335 = vmatpush3.bf16.msra.mxu1 %v1769_v15  ;;  %1032 = vmatmul.mubr.msk.f32.vlgmr.msra.gmra.mrb[0].mxu0 %vm98_vm1, %v81_v18  ;;  %s1617_s18 = scalar_lea.vmem %s855_s17, 1024  ;;  %p1622_p5 = scmp.lt.s32.totalorder %s855_s17, %s855_s17 }
  0x56   :  { %1336 = vmatprep.subr.bf16.mxu1 %v1653_v0  ;;  %1351 = vmatprep.subr.bf16.mxu0 %v1653_v0  ;;  %p1618_p4 = scmp.ne.s32.totalorder %s855_s17, %s1617_s18  ;;  %p1623_p6 = scmp.lt.s32.totalorder %s1617_s18, %s1617_s18 }
  0x57   :  { %1353 = vmatpush3.bf16.msra.mxu0 %v1761_v5  ;;  %1034 = vmatprep.mubr.msk.f32.mxu0 %vm98_vm1, %v82_v20 }
  0x58   :  { %1354 = vmatprep.subr.bf16.mxu0 %v1653_v0  ;;  %p1624_p7 = por %p1623_p6, %p1622_p5 }
  0x59   :  { %1338 = vmatpush3.bf16.msra.mxu1 %v1774_v19  ;;  %1035 = vmatmul.mubr.msk.f32.gmra.mrb[2].mxu0 %vm98_vm1, %v83_v23 }
  0x5a   :  { %1339 = vmatprep.subr.bf16.mxu1 %v1653_v0  ;;  %1037 = vmatprep.mubr.msk.f32.mxu0 %vm98_vm1, %v84_v35  ;;  %p1625_p8 = pnand %p1624_p7, %p1618_p4 }
  0x5b   :  { %1356 = vmatpush3.bf16.msra.mxu0 %v1764_v7 }
  0x5c   :  { %1357 = vmatprep.subr.bf16.mxu0 %v1653_v0 }
  0x5d   :  { %1341 = vmatpush3.bf16.msra.mxu1 %v1783_v24  ;;  %1038 = vmatmul.mubr.msk.f32.gmra.mrb[4].mxu0 %vm98_vm1, %v85_v36 }
  0x5e   :  { %1342 = vmatprep.subr.bf16.mxu1 %v1653_v0  ;;  %1040 = vmatprep.mubr.msk.f32.mxu0 %vm98_vm1, %v86_v37 }
  0x5f   :  { %1359 = vmatpush3.bf16.msra.mxu0 %v1769_v15 }
  0x60   :  { %1360 = vmatprep.subr.bf16.mxu0 %v1653_v0 }
  0x61   :  { %1344 = vmatpush3.bf16.msra.mxu1 %v1790_v27  ;;  %1041 = vmatmul.mubr.msk.f32.gmra.mrb[6].mxu0 %vm98_vm1, %v87_v38 }
  0x62   :  { %1345 = vmatprep.subr.bf16.mxu1 %v1653_v0  ;;  %1110 = vmatprep.mubr.msk.f32.mxu0 %vm1654_vm0, %v1655_v1 }
  0x63   :  { %1362 = vmatpush3.bf16.msra.mxu0 %v1774_v19 }
  0x64   :  { %1363 = vmatprep.subr.bf16.mxu0 %v1653_v0 }
  0x65   :  { %1347 = vmatpush3.bf16.msra.mxu1 %v1796_v30 }
  0x66   :  { %1348 = vmatprep.subr.bf16.mxu1 %v1653_v0 }
  0x67   :  { %1365 = vmatpush3.bf16.msra.mxu0 %v1783_v24 }
  0x68   :  { %1366 = vmatprep.subr.bf16.mxu0 %v1653_v0 }
  0x69   :  { %1350 = vmatpush3.bf16.msra.mxu1 %v1802_v33 }
  0x6a   :  { %1375 = vmatprep.subr.bf16.mxu1 %v1653_v0 }
  0x6b   :  { %1368 = vmatpush3.bf16.msra.mxu0 %v1790_v27 }
  0x6c   :  { %1076 = vmatmul.mubr.f32.vlgmr.msra.gmra.mrb[0].mxu1 %v78_v34  ;;  %1369 = vmatprep.subr.bf16.mxu0 %v1653_v0 }
  0x6d   :  { %1377 = vmatpush3.bf16.msra.mxu1 %v1761_v5  ;;  %1145 = vmatprep.mubr.msk.f32.mxu1 %vm1654_vm0, %v1655_v1 }
  0x6e   :  { %1378 = vmatprep.subr.bf16.mxu1 %v1653_v0 }
  0x6f   :  { %1371 = vmatpush3.bf16.msra.mxu0 %v1796_v30 }
  0x70   :  { %1372 = vmatprep.subr.bf16.mxu0 %v1653_v0 }
  0x71   :  { %1380 = vmatpush3.bf16.msra.mxu1 %v1764_v7 }
  0x72   :  { %1381 = vmatprep.subr.bf16.mxu1 %v1653_v0 }
  0x73   :  { %1374 = vmatpush3.bf16.msra.mxu0 %v1802_v33 }
  0x74   :  { %1399 = vmatprep.subr.bf16.mxu0 %v1653_v0 }
  0x75   :  { %1383 = vmatpush3.bf16.msra.mxu1 %v1769_v15 }
  0x76   :  { %1384 = vmatprep.subr.bf16.mxu1 %v1653_v0 }
  0x79   :  { %1386 = vmatpush3.bf16.msra.mxu1 %v1774_v19 }
  0x7a   :  { %1387 = vmatprep.subr.bf16.mxu1 %v1653_v0 }
  0x7d   :  { %1389 = vmatpush3.bf16.msra.mxu1 %v1783_v24 }
  0x7e   :  { %1390 = vmatprep.subr.bf16.mxu1 %v1653_v0 }
  0x81   :  { %1392 = vmatpush3.bf16.msra.mxu1 %v1790_v27 }
  0x82   :  { %1393 = vmatprep.subr.bf16.mxu1 %v1653_v0 }
  0x85   :  { %1395 = vmatpush3.bf16.msra.mxu1 %v1796_v30 }
  0x86   :  { %1396 = vmatprep.subr.bf16.mxu1 %v1653_v0 }
  0x89   :  { %1398 = vmatpush3.bf16.msra.mxu1 %v1802_v33 }
  0x8a   :  { %1423 = vmatprep.subr.bf16.mxu1 %v1653_v0 }
 0x128   :  { %v1033_v39 = vpop.f32.mrb[0].mxu0 }
 0x129   :  { %v193_v40 = vpop.f32.mrb[1].mxu0  ;;  %v199_v54 = vadd.f32 %v1033_v39, %v1845_v43 }
 0x12a   :  { %v194_v44 = vadd.f32 %v1845_v43, %v193_v40 }
 0x12c   :  { %v1840_v41 = vpop.f32.mrb[2].mxu0 }
 0x12d   :  { %v203_v42 = vpop.f32.mrb[3].mxu0  ;;  %v209_v4 = vadd.f32 %v1840_v41, %v1845_v43 }
 0x12e   :  { %v204_v60 = vadd.f32 %v1845_v43, %v203_v42 }
 0x130   :  { %v1866_v50 = vpop.f32.mrb[4].mxu0 }
 0x131   :  { %v1868_v51 = vpop.f32.mrb[5].mxu0 }
 0x132   :  { %v214_v12 = vadd.f32 %v1845_v43, %v1868_v51 }
 0x134   :  { %v1870_v52 = vpop.f32.mrb[6].mxu0 }
 0x135   :  { %v1872_v53 = vpop.f32.mrb[7].mxu0  ;;  %v229_v26 = vadd.f32 %v1870_v52, %v1845_v43 }
 0x136   :  { %v224_v21 = vadd.f32 %v1845_v43, %v1872_v53 }
 0x13f   :  { %v315_v45 = vpop.f32.mrb[0].mxu1 }
 0x140   :  { %v319_v46 = vadd.f32 %v315_v45, %v194_v44  ;;  %v1077_v47 = vpop.f32.mrb[1].mxu1 }
 0x142   :  { %v320_v48 = vmax.f32 %v319_v46, 0.0 }
 0x144   :  { %v321_v49 = vmin.f32 %v320_v48, 1.0 }
 0x146   :  { %322 = vst [vmem:[#allocation11] sm:$0xff] %v321_v49  ;;  %1111 = vmatmul.mubr.f32.vlgmr.msra.gmra.mrb[8].mxu0 %v321_v49 }
 0x147   :  { %1401 = vmatpush3.bf16.msra.mxu0 %v1761_v5  ;;  %1180 = vmatprep.mubr.msk.f32.mxu0 %vm1654_vm0, %v1655_v1 }
 0x148   :  { %1402 = vmatprep.subr.bf16.mxu0 %v1653_v0 }
 0x14b   :  { %1404 = vmatpush3.bf16.msra.mxu0 %v1764_v7 }
 0x14c   :  { %1405 = vmatprep.subr.bf16.mxu0 %v1653_v0 }
 0x14f   :  { %1407 = vmatpush3.bf16.msra.mxu0 %v1769_v15 }
 0x150   :  { %1408 = vmatprep.subr.bf16.mxu0 %v1653_v0 }
 0x153   :  { %1410 = vmatpush3.bf16.msra.mxu0 %v1774_v19 }
 0x154   :  { %1411 = vmatprep.subr.bf16.mxu0 %v1653_v0 }
 0x157   :  { %1413 = vmatpush3.bf16.msra.mxu0 %v1783_v24 }
 0x158   :  { %1414 = vmatprep.subr.bf16.mxu0 %v1653_v0 }
 0x15b   :  { %1416 = vmatpush3.bf16.msra.mxu0 %v1790_v27 }
 0x15c   :  { %1417 = vmatprep.subr.bf16.mxu0 %v1653_v0 }
 0x15f   :  { %1419 = vmatpush3.bf16.msra.mxu0 %v1796_v30 }
 0x160   :  { %1420 = vmatprep.subr.bf16.mxu0 %v1653_v0 }
 0x163   :  { %1422 = vmatpush3.bf16.msra.mxu0 %v1802_v33 }
 0x164   :  { %1447 = vmatprep.subr.bf16.mxu0 %v1653_v0 }
 0x219   :  { %v389_v55 = vpop.f32.mrb[8].mxu0 }
 0x21a   :  { %v393_v56 = vadd.f32 %v389_v55, %v199_v54  ;;  %v1112_v57 = vpop.f32.mrb[9].mxu0 }
 0x21c   :  { %v394_v58 = vmax.f32 %v393_v56, 0.0 }
 0x21e   :  { %v395_v59 = vmin.f32 %v394_v58, 1.0 }
 0x220   :  { %397 = vst [vmem:[#allocation11 + $0x8] sm:$0xff] %v395_v59  ;;  %1146 = vmatmul.mubr.f32.vlgmr.msra.gmra.mrb[2].mxu1 %v395_v59 }
 0x221   :  { %1425 = vmatpush3.bf16.msra.mxu1 %v1761_v5  ;;  %1215 = vmatprep.mubr.msk.f32.mxu1 %vm1654_vm0, %v1655_v1 }
 0x222   :  { %1426 = vmatprep.subr.bf16.mxu1 %v1653_v0 }
 0x225   :  { %1428 = vmatpush3.bf16.msra.mxu1 %v1764_v7 }
 0x226   :  { %1429 = vmatprep.subr.bf16.mxu1 %v1653_v0 }
 0x229   :  { %1431 = vmatpush3.bf16.msra.mxu1 %v1769_v15 }
 0x22a   :  { %1432 = vmatprep.subr.bf16.mxu1 %v1653_v0 }
 0x22d   :  { %1434 = vmatpush3.bf16.msra.mxu1 %v1774_v19 }
 0x22e   :  { %1435 = vmatprep.subr.bf16.mxu1 %v1653_v0 }
 0x231   :  { %1437 = vmatpush3.bf16.msra.mxu1 %v1783_v24 }
 0x232   :  { %1438 = vmatprep.subr.bf16.mxu1 %v1653_v0 }
 0x235   :  { %1440 = vmatpush3.bf16.msra.mxu1 %v1790_v27 }
 0x236   :  { %1441 = vmatprep.subr.bf16.mxu1 %v1653_v0 }
 0x239   :  { %1443 = vmatpush3.bf16.msra.mxu1 %v1796_v30 }
 0x23a   :  { %1444 = vmatprep.subr.bf16.mxu1 %v1653_v0 }
 0x23d   :  { %1446 = vmatpush3.bf16.msra.mxu1 %v1802_v33 }
 0x23e   :  { %1471 = vmatprep.subr.bf16.mxu1 %v1653_v0 }
 0x2f3   :  { %v464_v61 = vpop.f32.mrb[2].mxu1 }
 0x2f4   :  { %v468_v62 = vadd.f32 %v464_v61, %v204_v60  ;;  %v1147_v63 = vpop.f32.mrb[3].mxu1 }
 0x2f6   :  { %v469_v2 = vmax.f32 %v468_v62, 0.0 }
 0x2f8   :  { %v470_v3 = vmin.f32 %v469_v2, 1.0 }
 0x2fa   :  { %472 = vst [vmem:[#allocation11 + $0x10] sm:$0xff] %v470_v3  ;;  %1181 = vmatmul.mubr.f32.vlgmr.msra.gmra.mrb[10].mxu0 %v470_v3 }
 0x2fb   :  { %1449 = vmatpush3.bf16.msra.mxu0 %v1761_v5  ;;  %1250 = vmatprep.mubr.msk.f32.mxu0 %vm1654_vm0, %v1655_v1 }
 0x2fc   :  { %1450 = vmatprep.subr.bf16.mxu0 %v1653_v0 }
 0x2ff   :  { %1452 = vmatpush3.bf16.msra.mxu0 %v1764_v7 }
 0x300   :  { %1453 = vmatprep.subr.bf16.mxu0 %v1653_v0 }
 0x303   :  { %1455 = vmatpush3.bf16.msra.mxu0 %v1769_v15 }
 0x304   :  { %1456 = vmatprep.subr.bf16.mxu0 %v1653_v0 }
 0x307   :  { %1458 = vmatpush3.bf16.msra.mxu0 %v1774_v19 }
 0x308   :  { %1459 = vmatprep.subr.bf16.mxu0 %v1653_v0 }
 0x30b   :  { %1461 = vmatpush3.bf16.msra.mxu0 %v1783_v24 }
 0x30c   :  { %1462 = vmatprep.subr.bf16.mxu0 %v1653_v0 }
 0x30f   :  { %1464 = vmatpush3.bf16.msra.mxu0 %v1790_v27 }
 0x310   :  { %1465 = vmatprep.subr.bf16.mxu0 %v1653_v0 }
 0x313   :  { %1467 = vmatpush3.bf16.msra.mxu0 %v1796_v30 }
 0x314   :  { %1468 = vmatprep.subr.bf16.mxu0 %v1653_v0 }
 0x317   :  { %1470 = vmatpush3.bf16.msra.mxu0 %v1802_v33 }
 0x318   :  { %1495 = vmatprep.subr.bf16.mxu0 %v1653_v0 }
 0x3cd   :  { %v539_v6 = vpop.f32.mrb[10].mxu0 }
 0x3ce   :  { %v543_v8 = vadd.f32 %v539_v6, %v209_v4  ;;  %v1182_v9 = vpop.f32.mrb[11].mxu0 }
 0x3d0   :  { %v544_v10 = vmax.f32 %v543_v8, 0.0 }
 0x3d2   :  { %v545_v11 = vmin.f32 %v544_v10, 1.0 }
 0x3d4   :  { %547 = vst [vmem:[#allocation11 + $0x18] sm:$0xff] %v545_v11  ;;  %1216 = vmatmul.mubr.f32.vlgmr.msra.gmra.mrb[4].mxu1 %v545_v11 }
 0x3d5   :  { %1473 = vmatpush3.bf16.msra.mxu1 %v1761_v5  ;;  %1285 = vmatprep.mubr.msk.f32.mxu1 %vm1654_vm0, %v1655_v1 }
 0x3d6   :  { %1474 = vmatprep.subr.bf16.mxu1 %v1653_v0 }
 0x3d9   :  { %1476 = vmatpush3.bf16.msra.mxu1 %v1764_v7 }
 0x3da   :  { %1477 = vmatprep.subr.bf16.mxu1 %v1653_v0 }
 0x3dd   :  { %1479 = vmatpush3.bf16.msra.mxu1 %v1769_v15 }
 0x3de   :  { %1480 = vmatprep.subr.bf16.mxu1 %v1653_v0 }
 0x3e1   :  { %1482 = vmatpush3.bf16.msra.mxu1 %v1774_v19 }
 0x3e2   :  { %1483 = vmatprep.subr.bf16.mxu1 %v1653_v0 }
 0x3e5   :  { %1485 = vmatpush3.bf16.msra.mxu1 %v1783_v24 }
 0x3e6   :  { %1486 = vmatprep.subr.bf16.mxu1 %v1653_v0 }
 0x3e9   :  { %1488 = vmatpush3.bf16.msra.mxu1 %v1790_v27 }
 0x3ea   :  { %1489 = vmatprep.subr.bf16.mxu1 %v1653_v0 }
 0x3ed   :  { %1491 = vmatpush3.bf16.msra.mxu1 %v1796_v30 }
 0x3ee   :  { %1492 = vmatprep.subr.bf16.mxu1 %v1653_v0 }
 0x3f1   :  { %1494 = vmatpush3.bf16.msra.mxu1 %v1802_v33 }
 0x4a7   :  { %v614_v13 = vpop.f32.mrb[4].mxu1 }
 0x4a8   :  { %v618_v14 = vadd.f32 %v614_v13, %v214_v12  ;;  %v1217_v16 = vpop.f32.mrb[5].mxu1 }
 0x4aa   :  { %v619_v17 = vmax.f32 %v618_v14, 0.0 }
 0x4ac   :  { %v620_v18 = vmin.f32 %v619_v17, 1.0 }
 0x4ae   :  { %622 = vst [vmem:[#allocation11 + $0x20] sm:$0xff] %v620_v18  ;;  %1251 = vmatmul.mubr.f32.vlgmr.msra.gmra.mrb[12].mxu0 %v620_v18 }
 0x4af   :  { %1497 = vmatpush3.bf16.msra.mxu0 %v1761_v5  ;;  %1320 = vmatprep.mubr.msk.f32.mxu0 %vm1654_vm0, %v1655_v1  ;;  %v219_v1 = vadd.f32 %v1866_v50, %v1845_v43 }
 0x4b0   :  { %1498 = vmatprep.subr.bf16.mxu0 %v1653_v0 }
 0x4b3   :  { %1500 = vmatpush3.bf16.msra.mxu0 %v1764_v7 }
 0x4b4   :  { %1501 = vmatprep.subr.bf16.mxu0 %v1653_v0 }
 0x4b7   :  { %1503 = vmatpush3.bf16.msra.mxu0 %v1769_v15 }
 0x4b8   :  { %1504 = vmatprep.subr.bf16.mxu0 %v1653_v0 }
 0x4bb   :  { %1506 = vmatpush3.bf16.msra.mxu0 %v1774_v19 }
 0x4bc   :  { %1507 = vmatprep.subr.bf16.mxu0 %v1653_v0 }
 0x4bf   :  { %1509 = vmatpush3.bf16.msra.mxu0 %v1783_v24 }
 0x4c0   :  { %1510 = vmatprep.subr.bf16.mxu0 %v1653_v0 }
 0x4c3   :  { %1512 = vmatpush3.bf16.msra.mxu0 %v1790_v27 }
 0x4c4   :  { %1513 = vmatprep.subr.bf16.mxu0 %v1653_v0 }
 0x4c7   :  { %1515 = vmatpush3.bf16.msra.mxu0 %v1796_v30 }
 0x4c8   :  { %1516 = vmatprep.subr.bf16.mxu0 %v1653_v0 }
 0x4cb   :  { %1518 = vmatpush3.bf16.msra.mxu0 %v1802_v33 }
 0x581   :  { %v689_v5 = vpop.f32.mrb[12].mxu0 }
 0x582   :  { %v693_v7 = vadd.f32 %v689_v5, %v219_v1  ;;  %v1252_v15 = vpop.f32.mrb[13].mxu0 }
 0x584   :  { %v694_v19 = vmax.f32 %v693_v7, 0.0 }
 0x586   :  { %v695_v20 = vmin.f32 %v694_v19, 1.0 }
 0x588   :  { %697 = vst [vmem:[#allocation11 + $0x28] sm:$0xff] %v695_v20  ;;  %1286 = vmatmul.mubr.f32.vlgmr.msra.gmra.mrb[6].mxu1 %v695_v20 }
 0x65b   :  { %v764_v22 = vpop.f32.mrb[6].mxu1 }
 0x65c   :  { %v768_v23 = vadd.f32 %v764_v22, %v224_v21  ;;  %v1287_v24 = vpop.f32.mrb[7].mxu1 }
 0x65e   :  { %v769_v25 = vmax.f32 %v768_v23, 0.0 }
 0x660   :  { %v770_v0 = vmin.f32 %v769_v25, 1.0 }
 0x662   :  { %772 = vst [vmem:[#allocation11 + $0x30] sm:$0xff] %v770_v0  ;;  %1321 = vmatmul.mubr.f32.vlgmr.msra.gmra.mrb[14].mxu0 %v770_v0 }
 0x735   :  { %v839_v27 = vpop.f32.mrb[14].mxu0 }
 0x736   :  { %v843_v28 = vadd.f32 %v839_v27, %v229_v26  ;;  %v1322_v29 = vpop.f32.mrb[15].mxu0 }
 0x738   :  { %v844_v30 = vmax.f32 %v843_v28, 0.0 }
 0x73a   :  { %v845_v31 = vmin.f32 %v844_v30, 1.0 }
 0x73c   :  { %847 = vst [vmem:[#allocation11 + $0x38] sm:$0xff] %v845_v31 }
 0x73d   :  { %1628 = shalt.err (!%p1625_p8)
}
 0x73e   :  { %s1629_s22 = scalar_lea.hbm %s1976_s5, 1024 }
 0x73f   :  { %p1630_p9 = scmp.ne.s32.totalorder %s1976_s5, %s1629_s22  ;;  %p1633_p10 = scmp.lt.u32.totalorder %s1629_s22, %s1976_s5 }
 0x741   :  { %p1635_p11 = pnand %p1633_p10, %p1630_p9 }
 0x743   :  { %1638 = shalt.err (!%p1635_p11)
}
 0x744   :  { %860 = dma.vmem_to_hbm [thread:$0]  %s855_s17, 1024, %s1976_s5, [#allocation5], %s1649_s1, %s1649_s1, %s1650_s15  }
 0x745   :  { %1645 = dma.done.wait [#allocation5], 1024  }
 0x746   :  { %1646 = vsyncadd [#allocation5], 4294966272 }
 0x747   :  { %864 = vsyncpa [#allocation4], 1 }
 0x748   :  { %865 = vsyncpa [#allocation7], 1 }
 0x749   :  { %866 = vsyncpa [#allocation10], 1 }
 0x74a   :  { %867 = vsyncpa [#allocation5], 1 }

</bundles_post_ra>
